<compile_context>
chip_gen: v6e
topology: v6e:2x2x1
jax: 0.10.0
libtpu: 0.0.40
codegen_flags: <defaults>
</compile_context>

<pallas_src>
import functools

import jax
import jax.numpy as jnp
from jax import lax
from jax.experimental import pallas as pl
from jax.experimental.pallas import tpu as pltpu

EPS = 1e-5


def _shift_flat(x, s):
    """y[..., p] = x[..., p + s], zero where p + s falls outside [0, size)."""
    if s == 0:
        return x
    size = x.shape[-1]
    zeros = jnp.zeros(x.shape[:-1] + (abs(s),), x.dtype)
    if s > 0:
        return jnp.concatenate([x[..., s:], zeros], axis=-1)
    return jnp.concatenate([zeros, x[..., : size + s]], axis=-1)


def _im2col_taps(x, H, W):
    """x: (N, C, H*W).  Returns (N, 9*C, H*W) im2col tensor (tap-major,
    channel-minor along the contraction axis) with zeros at image borders."""
    HW = H * W
    col = lax.broadcasted_iota(jnp.int32, (1, 1, HW), 2) % W
    taps = []
    for kh in range(3):
        dh = kh - 1
        for kw in range(3):
            dw = kw - 1
            t = _shift_flat(x, dh * W + dw)          # handles the h border
            if dw != 0:                              # mask the w border wrap
                keep = jnp.logical_and(col + dw >= 0, col + dw < W)
                t = t * keep.astype(t.dtype)
            taps.append(t)
    return jnp.concatenate(taps, axis=1)


def _conv3x3(x_bf16, w_ref, H, W):
    """3x3 same-conv as a single batched im2col matmul (bf16 in, f32 acc)."""
    patches = _im2col_taps(x_bf16, H, W)                    # (N, 9C, HW) bf16
    n = x_bf16.shape[0]
    w_b = jnp.broadcast_to(w_ref[...], (n,) + w_ref.shape)  # (N, Cout, 9C)
    return jnp.einsum("nok,nkp->nop", w_b, patches,
                      preferred_element_type=jnp.float32)   # (N, Cout, HW) f32


def _batchnorm(acc, g_ref, b_ref, relu):
    """Training-mode BN over (N, C, HW): fused one-pass sum / sum-of-squares."""
    n, _, hw = acc.shape
    inv_cnt = 1.0 / float(n * hw)
    s1 = jnp.sum(acc, axis=(0, 2), keepdims=True)           # (1, C, 1)
    s2 = jnp.sum(acc * acc, axis=(0, 2), keepdims=True)     # (1, C, 1)
    mean = s1 * inv_cnt
    var = s2 * inv_cnt - mean * mean                        # biased variance
    scale = g_ref[...] * lax.rsqrt(var + EPS)               # (1, C, 1)
    shift = b_ref[...] - mean * scale                       # (1, C, 1)
    y = acc * scale + shift
    return jnp.maximum(y, 0.0) if relu else y


def basic_block_kernel(x_ref,   # (N, C, H*W)  f32, NCHW with spatial on lanes
                       w1_ref,  # (C, 9*C)     bf16, conv1 weight (im2col)
                       g1_ref,  # (C, 1)       bn1 gamma
                       b1_ref,  # (C, 1)       bn1 beta
                       w2_ref,  # (C, 9*C)     bf16, conv2 weight (im2col)
                       g2_ref,  # (C, 1)       bn2 gamma
                       b2_ref,  # (C, 1)       bn2 beta
                       out_ref,  # (N, C, H*W) output
                       *, H, W):
    x = x_ref[...]                                   # single load, reused below
    xb = x.astype(jnp.bfloat16)

    # conv1 -> bn1 -> relu
    acc1 = _conv3x3(xb, w1_ref, H, W)
    y = _batchnorm(acc1, g1_ref, b1_ref, relu=True)

    # conv2 -> bn2
    acc2 = _conv3x3(y.astype(jnp.bfloat16), w2_ref, H, W)
    z = _batchnorm(acc2, g2_ref, b2_ref, relu=False)

    # residual add (f32) + relu, lane-dense store
    out_ref[...] = jnp.maximum(z + x, 0.0).astype(out_ref.dtype)


@jax.jit
def basic_block_forward(x_nchw, w1_oihw, g1, b1, w2_oihw, g2, b2):
    """x_nchw: (N, C, H, W) f32.  Conv weights in PyTorch OIHW layout."""
    N, C, H, W = x_nchw.shape
    HW = H * W

    # Free (contiguous) reshape only — no transpose, no pad, single copy of x.
    x_flat = x_nchw.reshape(N, C, HW)

    # One-time weight repack: OIHW -> (Cout, KH*KW*Cin), tap-major / ch-minor,
    # bf16 operands for the MXU (accumulation stays f32 in-kernel).
    def repack(w):
        return w.transpose(0, 2, 3, 1).reshape(C, 9 * C).astype(jnp.bfloat16)

    vmem = pl.BlockSpec(memory_space=pltpu.MemorySpace.VMEM)
    cost = pl.CostEstimate(
        flops=2 * (2 * N * HW * C * 9 * C) + 12 * N * C * HW,
        transcendentals=2 * C,
        bytes_accessed=2 * N * C * HW * 4 + 2 * (C * 9 * C * 2) + 4 * C * 4,
    )

    out_flat = pl.pallas_call(
        functools.partial(basic_block_kernel, H=H, W=W),
        out_shape=jax.ShapeDtypeStruct((N, C, HW), x_nchw.dtype),
        in_specs=[vmem] * 7,
        out_specs=vmem,
        compiler_params=pltpu.CompilerParams(
            vmem_limit_bytes=32 * 1024 * 1024),
        cost_estimate=cost,
    )(
        x_flat,
        repack(w1_oihw), g1.reshape(C, 1), b1.reshape(C, 1),
        repack(w2_oihw), g2.reshape(C, 1), b2.reshape(C, 1),
    )
    return out_flat.reshape(N, C, H, W)


# ---------------- pure-JAX reference (for a sanity check) ----------------
def _reference(x, w1, g1, b1, w2, g2, b2):
    dn = ("NCHW", "OIHW", "NCHW")

    def conv(a, w):
        return lax.conv_general_dilated(a, w, (1, 1), ((1, 1), (1, 1)),
                                        dimension_numbers=dn)

    def bn(a, g, b):
        m = jnp.mean(a, axis=(0, 2, 3), keepdims=True)
        v = jnp.mean((a - m) ** 2, axis=(0, 2, 3), keepdims=True)
        return ((a - m) * lax.rsqrt(v + EPS) * g.reshape(1, -1, 1, 1)
                + b.reshape(1, -1, 1, 1))

    y = jnp.maximum(bn(conv(x, w1), g1, b1), 0.0)
    z = bn(conv(y, w2), g2, b2) + x
    return jnp.maximum(z, 0.0)


if __name__ == "__main__":
    # Small shapes consistent with BasicBlock(in_planes=4, planes=4, stride=1).
    N, C, H, W = 2, 4, 16, 16
    key = jax.random.PRNGKey(0)
    kx, k1, k2, kg1, kb1, kg2, kb2 = jax.random.split(key, 7)

    x = jax.random.normal(kx, (N, C, H, W), jnp.float32)
    # Deterministic synthetic parameters (PyTorch OIHW layout for conv weights).
    w1 = jax.random.normal(k1, (C, C, 3, 3), jnp.float32) * 0.1
    w2 = jax.random.normal(k2, (C, C, 3, 3), jnp.float32) * 0.1
    g1 = 1.0 + 0.1 * jax.random.normal(kg1, (C,), jnp.float32)
    b1 = 0.1 * jax.random.normal(kb1, (C,), jnp.float32)
    g2 = 1.0 + 0.1 * jax.random.normal(kg2, (C,), jnp.float32)
    b2 = 0.1 * jax.random.normal(kb2, (C,), jnp.float32)

    out = basic_block_forward(x, w1, g1, b1, w2, g2, b2)
    out = jax.block_until_ready(out)

    ref = _reference(x, w1, g1, b1, w2, g2, b2)
    assert out.shape == (N, C, H, W)
    # bf16 MXU operands (f32 accumulation) => relaxed tolerance vs f32 reference.
    err = float(jnp.max(jnp.abs(out - ref)))
    assert jnp.allclose(out, ref, rtol=5e-2, atol=5e-2), (
        f"mismatch vs reference, max abs err = {err}")

    print("KERNEL_OK")
</pallas_src>

<mosaic_0001>
module attributes {stable_mosaic.version = 11 : i64} {
  func.func @basic_block_kernel(%arg0: memref<2x4x256xf32, #tpu.memory_space<vmem>>, %arg1: memref<4x36xbf16, #tpu.memory_space<vmem>>, %arg2: memref<4x1xf32, #tpu.memory_space<vmem>>, %arg3: memref<4x1xf32, #tpu.memory_space<vmem>>, %arg4: memref<4x36xbf16, #tpu.memory_space<vmem>>, %arg5: memref<4x1xf32, #tpu.memory_space<vmem>>, %arg6: memref<4x1xf32, #tpu.memory_space<vmem>>, %arg7: memref<2x4x256xf32, #tpu.memory_space<vmem>>) attributes {dimension_semantics = [], scalar_prefetch = 0 : i64, scratch_operands = 0 : i64, tpu.core_type = #tpu.core_type<tc>} {
    %c0 = arith.constant 0 : index
    %c0_0 = arith.constant 0 : index
    %c0_1 = arith.constant 0 : index
    %0 = vector.load %arg0[%c0, %c0_0, %c0_1] : memref<2x4x256xf32, #tpu.memory_space<vmem>>, vector<2x4x256xf32>
    %1 = arith.truncf %0 : vector<2x4x256xf32> to vector<2x4x256xbf16>
    %2 = tpu.iota {dimensions = array<i32: 2>} : vector<1x1x256xi32>
    %c16_i32 = arith.constant 16 : i32
    %c0_i32 = arith.constant 0 : i32
    %3 = arith.cmpi eq, %c16_i32, %c0_i32 : i32
    %c1_i32 = arith.constant 1 : i32
    %4 = arith.select %3, %c1_i32, %c16_i32 : i32
    %5 = vector.broadcast %4 : i32 to vector<1x1x256xi32>
    %6 = arith.remsi %2, %5 : vector<1x1x256xi32>
    %c0_i32_2 = arith.constant 0 : i32
    %7 = vector.broadcast %c0_i32_2 : i32 to vector<1x1x256xi32>
    %8 = arith.cmpi ne, %6, %7 : vector<1x1x256xi32>
    %c0_i32_3 = arith.constant 0 : i32
    %9 = vector.broadcast %c0_i32_3 : i32 to vector<1x1x256xi32>
    %10 = arith.cmpi slt, %6, %9 : vector<1x1x256xi32>
    %c0_i32_4 = arith.constant 0 : i32
    %11 = arith.cmpi slt, %4, %c0_i32_4 : i32
    %12 = vector.broadcast %11 : i1 to vector<1x1x256xi1>
    %13 = vector.broadcast %12 : vector<1x1x256xi1> to vector<1x1x256xi1>
    %14 = arith.xori %10, %13 : vector<1x1x256xi1>
    %15 = arith.andi %14, %8 : vector<1x1x256xi1>
    %16 = vector.broadcast %4 : i32 to vector<1x1x256xi32>
    %17 = arith.addi %6, %16 : vector<1x1x256xi32>
    %18 = arith.select %15, %17, %6 : vector<1x1x256xi1>, vector<1x1x256xi32>
    %cst = arith.constant 0.000000e+00 : bf16
    %19 = vector.broadcast %cst : bf16 to vector<2x4x17xbf16>
    %20 = vector.extract_strided_slice %1 {offsets = [0, 0, 0], sizes = [2, 4, 239], strides = [1, 1, 1]} : vector<2x4x256xbf16> to vector<2x4x239xbf16>
    %21 = tpu.concatenate %19, %20 in 2 : vector<2x4x17xbf16>, vector<2x4x239xbf16> -> vector<2x4x256xbf16>
    %c-1_i32 = arith.constant -1 : i32
    %22 = vector.broadcast %c-1_i32 : i32 to vector<1x1x256xi32>
    %23 = arith.addi %18, %22 : vector<1x1x256xi32>
    %c0_i32_5 = arith.constant 0 : i32
    %24 = vector.broadcast %c0_i32_5 : i32 to vector<1x1x256xi32>
    %25 = arith.cmpi sge, %23, %24 : vector<1x1x256xi32>
    %c-1_i32_6 = arith.constant -1 : i32
    %26 = vector.broadcast %c-1_i32_6 : i32 to vector<1x1x256xi32>
    %27 = arith.addi %18, %26 : vector<1x1x256xi32>
    %c16_i32_7 = arith.constant 16 : i32
    %28 = vector.broadcast %c16_i32_7 : i32 to vector<1x1x256xi32>
    %29 = arith.cmpi slt, %27, %28 : vector<1x1x256xi32>
    %30 = arith.andi %25, %29 : vector<1x1x256xi1>
    %31 = arith.extui %30 : vector<1x1x256xi1> to vector<1x1x256xi32>
    %32 = arith.sitofp %31 : vector<1x1x256xi32> to vector<1x1x256xf32>
    %33 = arith.truncf %32 : vector<1x1x256xf32> to vector<1x1x256xbf16>
    %34 = vector.broadcast %33 : vector<1x1x256xbf16> to vector<2x4x256xbf16>
    %35 = arith.mulf %21, %34 : vector<2x4x256xbf16>
    %cst_8 = arith.constant 0.000000e+00 : bf16
    %36 = vector.broadcast %cst_8 : bf16 to vector<2x4x16xbf16>
    %37 = vector.extract_strided_slice %1 {offsets = [0, 0, 0], sizes = [2, 4, 240], strides = [1, 1, 1]} : vector<2x4x256xbf16> to vector<2x4x240xbf16>
    %38 = tpu.concatenate %36, %37 in 2 : vector<2x4x16xbf16>, vector<2x4x240xbf16> -> vector<2x4x256xbf16>
    %cst_9 = arith.constant 0.000000e+00 : bf16
    %39 = vector.broadcast %cst_9 : bf16 to vector<2x4x15xbf16>
    %40 = vector.extract_strided_slice %1 {offsets = [0, 0, 0], sizes = [2, 4, 241], strides = [1, 1, 1]} : vector<2x4x256xbf16> to vector<2x4x241xbf16>
    %41 = tpu.concatenate %39, %40 in 2 : vector<2x4x15xbf16>, vector<2x4x241xbf16> -> vector<2x4x256xbf16>
    %c1_i32_10 = arith.constant 1 : i32
    %42 = vector.broadcast %c1_i32_10 : i32 to vector<1x1x256xi32>
    %43 = arith.addi %18, %42 : vector<1x1x256xi32>
    %c0_i32_11 = arith.constant 0 : i32
    %44 = vector.broadcast %c0_i32_11 : i32 to vector<1x1x256xi32>
    %45 = arith.cmpi sge, %43, %44 : vector<1x1x256xi32>
    %c1_i32_12 = arith.constant 1 : i32
    %46 = vector.broadcast %c1_i32_12 : i32 to vector<1x1x256xi32>
    %47 = arith.addi %18, %46 : vector<1x1x256xi32>
    %c16_i32_13 = arith.constant 16 : i32
    %48 = vector.broadcast %c16_i32_13 : i32 to vector<1x1x256xi32>
    %49 = arith.cmpi slt, %47, %48 : vector<1x1x256xi32>
    %50 = arith.andi %45, %49 : vector<1x1x256xi1>
    %51 = arith.extui %50 : vector<1x1x256xi1> to vector<1x1x256xi32>
    %52 = arith.sitofp %51 : vector<1x1x256xi32> to vector<1x1x256xf32>
    %53 = arith.truncf %52 : vector<1x1x256xf32> to vector<1x1x256xbf16>
    %54 = vector.broadcast %53 : vector<1x1x256xbf16> to vector<2x4x256xbf16>
    %55 = arith.mulf %41, %54 : vector<2x4x256xbf16>
    %cst_14 = arith.constant 0.000000e+00 : bf16
    %56 = vector.broadcast %cst_14 : bf16 to vector<2x4x1xbf16>
    %57 = vector.extract_strided_slice %1 {offsets = [0, 0, 0], sizes = [2, 4, 255], strides = [1, 1, 1]} : vector<2x4x256xbf16> to vector<2x4x255xbf16>
    %58 = tpu.concatenate %56, %57 in 2 : vector<2x4x1xbf16>, vector<2x4x255xbf16> -> vector<2x4x256xbf16>
    %c-1_i32_15 = arith.constant -1 : i32
    %59 = vector.broadcast %c-1_i32_15 : i32 to vector<1x1x256xi32>
    %60 = arith.addi %18, %59 : vector<1x1x256xi32>
    %c0_i32_16 = arith.constant 0 : i32
    %61 = vector.broadcast %c0_i32_16 : i32 to vector<1x1x256xi32>
    %62 = arith.cmpi sge, %60, %61 : vector<1x1x256xi32>
    %c-1_i32_17 = arith.constant -1 : i32
    %63 = vector.broadcast %c-1_i32_17 : i32 to vector<1x1x256xi32>
    %64 = arith.addi %18, %63 : vector<1x1x256xi32>
    %c16_i32_18 = arith.constant 16 : i32
    %65 = vector.broadcast %c16_i32_18 : i32 to vector<1x1x256xi32>
    %66 = arith.cmpi slt, %64, %65 : vector<1x1x256xi32>
    %67 = arith.andi %62, %66 : vector<1x1x256xi1>
    %68 = arith.extui %67 : vector<1x1x256xi1> to vector<1x1x256xi32>
    %69 = arith.sitofp %68 : vector<1x1x256xi32> to vector<1x1x256xf32>
    %70 = arith.truncf %69 : vector<1x1x256xf32> to vector<1x1x256xbf16>
    %71 = vector.broadcast %70 : vector<1x1x256xbf16> to vector<2x4x256xbf16>
    %72 = arith.mulf %58, %71 : vector<2x4x256xbf16>
    %cst_19 = arith.constant 0.000000e+00 : bf16
    %73 = vector.broadcast %cst_19 : bf16 to vector<2x4x1xbf16>
    %74 = vector.extract_strided_slice %1 {offsets = [0, 0, 1], sizes = [2, 4, 255], strides = [1, 1, 1]} : vector<2x4x256xbf16> to vector<2x4x255xbf16>
    %75 = tpu.concatenate %74, %73 in 2 : vector<2x4x255xbf16>, vector<2x4x1xbf16> -> vector<2x4x256xbf16>
    %c1_i32_20 = arith.constant 1 : i32
    %76 = vector.broadcast %c1_i32_20 : i32 to vector<1x1x256xi32>
    %77 = arith.addi %18, %76 : vector<1x1x256xi32>
    %c0_i32_21 = arith.constant 0 : i32
    %78 = vector.broadcast %c0_i32_21 : i32 to vector<1x1x256xi32>
    %79 = arith.cmpi sge, %77, %78 : vector<1x1x256xi32>
    %c1_i32_22 = arith.constant 1 : i32
    %80 = vector.broadcast %c1_i32_22 : i32 to vector<1x1x256xi32>
    %81 = arith.addi %18, %80 : vector<1x1x256xi32>
    %c16_i32_23 = arith.constant 16 : i32
    %82 = vector.broadcast %c16_i32_23 : i32 to vector<1x1x256xi32>
    %83 = arith.cmpi slt, %81, %82 : vector<1x1x256xi32>
    %84 = arith.andi %79, %83 : vector<1x1x256xi1>
    %85 = arith.extui %84 : vector<1x1x256xi1> to vector<1x1x256xi32>
    %86 = arith.sitofp %85 : vector<1x1x256xi32> to vector<1x1x256xf32>
    %87 = arith.truncf %86 : vector<1x1x256xf32> to vector<1x1x256xbf16>
    %88 = vector.broadcast %87 : vector<1x1x256xbf16> to vector<2x4x256xbf16>
    %89 = arith.mulf %75, %88 : vector<2x4x256xbf16>
    %cst_24 = arith.constant 0.000000e+00 : bf16
    %90 = vector.broadcast %cst_24 : bf16 to vector<2x4x15xbf16>
    %91 = vector.extract_strided_slice %1 {offsets = [0, 0, 15], sizes = [2, 4, 241], strides = [1, 1, 1]} : vector<2x4x256xbf16> to vector<2x4x241xbf16>
    %92 = tpu.concatenate %91, %90 in 2 : vector<2x4x241xbf16>, vector<2x4x15xbf16> -> vector<2x4x256xbf16>
    %c-1_i32_25 = arith.constant -1 : i32
    %93 = vector.broadcast %c-1_i32_25 : i32 to vector<1x1x256xi32>
    %94 = arith.addi %18, %93 : vector<1x1x256xi32>
    %c0_i32_26 = arith.constant 0 : i32
    %95 = vector.broadcast %c0_i32_26 : i32 to vector<1x1x256xi32>
    %96 = arith.cmpi sge, %94, %95 : vector<1x1x256xi32>
    %c-1_i32_27 = arith.constant -1 : i32
    %97 = vector.broadcast %c-1_i32_27 : i32 to vector<1x1x256xi32>
    %98 = arith.addi %18, %97 : vector<1x1x256xi32>
    %c16_i32_28 = arith.constant 16 : i32
    %99 = vector.broadcast %c16_i32_28 : i32 to vector<1x1x256xi32>
    %100 = arith.cmpi slt, %98, %99 : vector<1x1x256xi32>
    %101 = arith.andi %96, %100 : vector<1x1x256xi1>
    %102 = arith.extui %101 : vector<1x1x256xi1> to vector<1x1x256xi32>
    %103 = arith.sitofp %102 : vector<1x1x256xi32> to vector<1x1x256xf32>
    %104 = arith.truncf %103 : vector<1x1x256xf32> to vector<1x1x256xbf16>
    %105 = vector.broadcast %104 : vector<1x1x256xbf16> to vector<2x4x256xbf16>
    %106 = arith.mulf %92, %105 : vector<2x4x256xbf16>
    %cst_29 = arith.constant 0.000000e+00 : bf16
    %107 = vector.broadcast %cst_29 : bf16 to vector<2x4x16xbf16>
    %108 = vector.extract_strided_slice %1 {offsets = [0, 0, 16], sizes = [2, 4, 240], strides = [1, 1, 1]} : vector<2x4x256xbf16> to vector<2x4x240xbf16>
    %109 = tpu.concatenate %108, %107 in 2 : vector<2x4x240xbf16>, vector<2x4x16xbf16> -> vector<2x4x256xbf16>
    %cst_30 = arith.constant 0.000000e+00 : bf16
    %110 = vector.broadcast %cst_30 : bf16 to vector<2x4x17xbf16>
    %111 = vector.extract_strided_slice %1 {offsets = [0, 0, 17], sizes = [2, 4, 239], strides = [1, 1, 1]} : vector<2x4x256xbf16> to vector<2x4x239xbf16>
    %112 = tpu.concatenate %111, %110 in 2 : vector<2x4x239xbf16>, vector<2x4x17xbf16> -> vector<2x4x256xbf16>
    %c1_i32_31 = arith.constant 1 : i32
    %113 = vector.broadcast %c1_i32_31 : i32 to vector<1x1x256xi32>
    %114 = arith.addi %18, %113 : vector<1x1x256xi32>
    %c0_i32_32 = arith.constant 0 : i32
    %115 = vector.broadcast %c0_i32_32 : i32 to vector<1x1x256xi32>
    %116 = arith.cmpi sge, %114, %115 : vector<1x1x256xi32>
    %c1_i32_33 = arith.constant 1 : i32
    %117 = vector.broadcast %c1_i32_33 : i32 to vector<1x1x256xi32>
    %118 = arith.addi %18, %117 : vector<1x1x256xi32>
    %c16_i32_34 = arith.constant 16 : i32
    %119 = vector.broadcast %c16_i32_34 : i32 to vector<1x1x256xi32>
    %120 = arith.cmpi slt, %118, %119 : vector<1x1x256xi32>
    %121 = arith.andi %116, %120 : vector<1x1x256xi1>
    %122 = arith.extui %121 : vector<1x1x256xi1> to vector<1x1x256xi32>
    %123 = arith.sitofp %122 : vector<1x1x256xi32> to vector<1x1x256xf32>
    %124 = arith.truncf %123 : vector<1x1x256xf32> to vector<1x1x256xbf16>
    %125 = vector.broadcast %124 : vector<1x1x256xbf16> to vector<2x4x256xbf16>
    %126 = arith.mulf %112, %125 : vector<2x4x256xbf16>
    %127 = tpu.concatenate %35, %38, %55, %72, %1, %89, %106, %109, %126 in 1 : vector<2x4x256xbf16>, vector<2x4x256xbf16>, vector<2x4x256xbf16>, vector<2x4x256xbf16>, vector<2x4x256xbf16>, vector<2x4x256xbf16>, vector<2x4x256xbf16>, vector<2x4x256xbf16>, vector<2x4x256xbf16> -> vector<2x36x256xbf16>
    %c0_35 = arith.constant 0 : index
    %c0_36 = arith.constant 0 : index
    %128 = vector.load %arg1[%c0_35, %c0_36] : memref<4x36xbf16, #tpu.memory_space<vmem>>, vector<4x36xbf16>
    %129 = vector.shape_cast %128 : vector<4x36xbf16> to vector<1x4x36xbf16>
    %130 = vector.broadcast %129 : vector<1x4x36xbf16> to vector<2x4x36xbf16>
    "tpu.trace_start"() <{level = 10 : i32, message = "nok,nkp->nop"}> : () -> ()
    %cst_37 = arith.constant dense<0.000000e+00> : vector<2x4x256xf32>
    %131 = tpu.matmul %130, %127, %cst_37 {dimension_numbers = #tpu.dot_dimension_numbers<[2], [1], [1], [2], [0, 0, 0, 1, 1, 2], [0], [0]>} : vector<2x4x36xbf16>, vector<2x36x256xbf16>, vector<2x4x256xf32> -> vector<2x4x256xf32>
    "tpu.trace_stop"() : () -> ()
    %cst_38 = arith.constant dense<0.000000e+00> : vector<4xf32>
    %132 = vector.multi_reduction <add>, %131, %cst_38 [0, 2] : vector<2x4x256xf32> to vector<4xf32>
    %133 = vector.shape_cast %132 : vector<4xf32> to vector<1x4x1xf32>
    %134 = arith.mulf %131, %131 : vector<2x4x256xf32>
    %cst_39 = arith.constant dense<0.000000e+00> : vector<4xf32>
    %135 = vector.multi_reduction <add>, %134, %cst_39 [0, 2] : vector<2x4x256xf32> to vector<4xf32>
    %136 = vector.shape_cast %135 : vector<4xf32> to vector<1x4x1xf32>
    %cst_40 = arith.constant 0.001953125 : f32
    %137 = vector.broadcast %cst_40 : f32 to vector<1x4x1xf32>
    %138 = arith.mulf %133, %137 : vector<1x4x1xf32>
    %cst_41 = arith.constant 0.001953125 : f32
    %139 = vector.broadcast %cst_41 : f32 to vector<1x4x1xf32>
    %140 = arith.mulf %136, %139 : vector<1x4x1xf32>
    %141 = arith.mulf %138, %138 : vector<1x4x1xf32>
    %142 = arith.subf %140, %141 : vector<1x4x1xf32>
    %c0_42 = arith.constant 0 : index
    %c0_43 = arith.constant 0 : index
    %143 = vector.load %arg2[%c0_42, %c0_43] : memref<4x1xf32, #tpu.memory_space<vmem>>, vector<4x1xf32>
    %cst_44 = arith.constant 9.99999974E-6 : f32
    %144 = vector.broadcast %cst_44 : f32 to vector<1x4x1xf32>
    %145 = arith.addf %142, %144 : vector<1x4x1xf32>
    %146 = math.rsqrt %145 : vector<1x4x1xf32>
    %147 = vector.shape_cast %143 : vector<4x1xf32> to vector<1x4x1xf32>
    %148 = arith.mulf %147, %146 : vector<1x4x1xf32>
    %c0_45 = arith.constant 0 : index
    %c0_46 = arith.constant 0 : index
    %149 = vector.load %arg3[%c0_45, %c0_46] : memref<4x1xf32, #tpu.memory_space<vmem>>, vector<4x1xf32>
    %150 = arith.mulf %138, %148 : vector<1x4x1xf32>
    %151 = vector.shape_cast %149 : vector<4x1xf32> to vector<1x4x1xf32>
    %152 = arith.subf %151, %150 : vector<1x4x1xf32>
    %153 = vector.broadcast %148 : vector<1x4x1xf32> to vector<2x4x256xf32>
    %154 = arith.mulf %131, %153 : vector<2x4x256xf32>
    %155 = vector.broadcast %152 : vector<1x4x1xf32> to vector<2x4x256xf32>
    %156 = arith.addf %154, %155 : vector<2x4x256xf32>
    %cst_47 = arith.constant 0.000000e+00 : f32
    %157 = vector.broadcast %cst_47 : f32 to vector<2x4x256xf32>
    %158 = arith.maximumf %156, %157 : vector<2x4x256xf32>
    %159 = arith.truncf %158 : vector<2x4x256xf32> to vector<2x4x256xbf16>
    %160 = tpu.iota {dimensions = array<i32: 2>} : vector<1x1x256xi32>
    %c16_i32_48 = arith.constant 16 : i32
    %c0_i32_49 = arith.constant 0 : i32
    %161 = arith.cmpi eq, %c16_i32_48, %c0_i32_49 : i32
    %c1_i32_50 = arith.constant 1 : i32
    %162 = arith.select %161, %c1_i32_50, %c16_i32_48 : i32
    %163 = vector.broadcast %162 : i32 to vector<1x1x256xi32>
    %164 = arith.remsi %160, %163 : vector<1x1x256xi32>
    %c0_i32_51 = arith.constant 0 : i32
    %165 = vector.broadcast %c0_i32_51 : i32 to vector<1x1x256xi32>
    %166 = arith.cmpi ne, %164, %165 : vector<1x1x256xi32>
    %c0_i32_52 = arith.constant 0 : i32
    %167 = vector.broadcast %c0_i32_52 : i32 to vector<1x1x256xi32>
    %168 = arith.cmpi slt, %164, %167 : vector<1x1x256xi32>
    %c0_i32_53 = arith.constant 0 : i32
    %169 = arith.cmpi slt, %162, %c0_i32_53 : i32
    %170 = vector.broadcast %169 : i1 to vector<1x1x256xi1>
    %171 = vector.broadcast %170 : vector<1x1x256xi1> to vector<1x1x256xi1>
    %172 = arith.xori %168, %171 : vector<1x1x256xi1>
    %173 = arith.andi %172, %166 : vector<1x1x256xi1>
    %174 = vector.broadcast %162 : i32 to vector<1x1x256xi32>
    %175 = arith.addi %164, %174 : vector<1x1x256xi32>
    %176 = arith.select %173, %175, %164 : vector<1x1x256xi1>, vector<1x1x256xi32>
    %cst_54 = arith.constant 0.000000e+00 : bf16
    %177 = vector.broadcast %cst_54 : bf16 to vector<2x4x17xbf16>
    %178 = vector.extract_strided_slice %159 {offsets = [0, 0, 0], sizes = [2, 4, 239], strides = [1, 1, 1]} : vector<2x4x256xbf16> to vector<2x4x239xbf16>
    %179 = tpu.concatenate %177, %178 in 2 : vector<2x4x17xbf16>, vector<2x4x239xbf16> -> vector<2x4x256xbf16>
    %c-1_i32_55 = arith.constant -1 : i32
    %180 = vector.broadcast %c-1_i32_55 : i32 to vector<1x1x256xi32>
    %181 = arith.addi %176, %180 : vector<1x1x256xi32>
    %c0_i32_56 = arith.constant 0 : i32
    %182 = vector.broadcast %c0_i32_56 : i32 to vector<1x1x256xi32>
    %183 = arith.cmpi sge, %181, %182 : vector<1x1x256xi32>
    %c-1_i32_57 = arith.constant -1 : i32
    %184 = vector.broadcast %c-1_i32_57 : i32 to vector<1x1x256xi32>
    %185 = arith.addi %176, %184 : vector<1x1x256xi32>
    %c16_i32_58 = arith.constant 16 : i32
    %186 = vector.broadcast %c16_i32_58 : i32 to vector<1x1x256xi32>
    %187 = arith.cmpi slt, %185, %186 : vector<1x1x256xi32>
    %188 = arith.andi %183, %187 : vector<1x1x256xi1>
    %189 = arith.extui %188 : vector<1x1x256xi1> to vector<1x1x256xi32>
    %190 = arith.sitofp %189 : vector<1x1x256xi32> to vector<1x1x256xf32>
    %191 = arith.truncf %190 : vector<1x1x256xf32> to vector<1x1x256xbf16>
    %192 = vector.broadcast %191 : vector<1x1x256xbf16> to vector<2x4x256xbf16>
    %193 = arith.mulf %179, %192 : vector<2x4x256xbf16>
    %cst_59 = arith.constant 0.000000e+00 : bf16
    %194 = vector.broadcast %cst_59 : bf16 to vector<2x4x16xbf16>
    %195 = vector.extract_strided_slice %159 {offsets = [0, 0, 0], sizes = [2, 4, 240], strides = [1, 1, 1]} : vector<2x4x256xbf16> to vector<2x4x240xbf16>
    %196 = tpu.concatenate %194, %195 in 2 : vector<2x4x16xbf16>, vector<2x4x240xbf16> -> vector<2x4x256xbf16>
    %cst_60 = arith.constant 0.000000e+00 : bf16
    %197 = vector.broadcast %cst_60 : bf16 to vector<2x4x15xbf16>
    %198 = vector.extract_strided_slice %159 {offsets = [0, 0, 0], sizes = [2, 4, 241], strides = [1, 1, 1]} : vector<2x4x256xbf16> to vector<2x4x241xbf16>
    %199 = tpu.concatenate %197, %198 in 2 : vector<2x4x15xbf16>, vector<2x4x241xbf16> -> vector<2x4x256xbf16>
    %c1_i32_61 = arith.constant 1 : i32
    %200 = vector.broadcast %c1_i32_61 : i32 to vector<1x1x256xi32>
    %201 = arith.addi %176, %200 : vector<1x1x256xi32>
    %c0_i32_62 = arith.constant 0 : i32
    %202 = vector.broadcast %c0_i32_62 : i32 to vector<1x1x256xi32>
    %203 = arith.cmpi sge, %201, %202 : vector<1x1x256xi32>
    %c1_i32_63 = arith.constant 1 : i32
    %204 = vector.broadcast %c1_i32_63 : i32 to vector<1x1x256xi32>
    %205 = arith.addi %176, %204 : vector<1x1x256xi32>
    %c16_i32_64 = arith.constant 16 : i32
    %206 = vector.broadcast %c16_i32_64 : i32 to vector<1x1x256xi32>
    %207 = arith.cmpi slt, %205, %206 : vector<1x1x256xi32>
    %208 = arith.andi %203, %207 : vector<1x1x256xi1>
    %209 = arith.extui %208 : vector<1x1x256xi1> to vector<1x1x256xi32>
    %210 = arith.sitofp %209 : vector<1x1x256xi32> to vector<1x1x256xf32>
    %211 = arith.truncf %210 : vector<1x1x256xf32> to vector<1x1x256xbf16>
    %212 = vector.broadcast %211 : vector<1x1x256xbf16> to vector<2x4x256xbf16>
    %213 = arith.mulf %199, %212 : vector<2x4x256xbf16>
    %cst_65 = arith.constant 0.000000e+00 : bf16
    %214 = vector.broadcast %cst_65 : bf16 to vector<2x4x1xbf16>
    %215 = vector.extract_strided_slice %159 {offsets = [0, 0, 0], sizes = [2, 4, 255], strides = [1, 1, 1]} : vector<2x4x256xbf16> to vector<2x4x255xbf16>
    %216 = tpu.concatenate %214, %215 in 2 : vector<2x4x1xbf16>, vector<2x4x255xbf16> -> vector<2x4x256xbf16>
    %c-1_i32_66 = arith.constant -1 : i32
    %217 = vector.broadcast %c-1_i32_66 : i32 to vector<1x1x256xi32>
    %218 = arith.addi %176, %217 : vector<1x1x256xi32>
    %c0_i32_67 = arith.constant 0 : i32
    %219 = vector.broadcast %c0_i32_67 : i32 to vector<1x1x256xi32>
    %220 = arith.cmpi sge, %218, %219 : vector<1x1x256xi32>
    %c-1_i32_68 = arith.constant -1 : i32
    %221 = vector.broadcast %c-1_i32_68 : i32 to vector<1x1x256xi32>
    %222 = arith.addi %176, %221 : vector<1x1x256xi32>
    %c16_i32_69 = arith.constant 16 : i32
    %223 = vector.broadcast %c16_i32_69 : i32 to vector<1x1x256xi32>
    %224 = arith.cmpi slt, %222, %223 : vector<1x1x256xi32>
    %225 = arith.andi %220, %224 : vector<1x1x256xi1>
    %226 = arith.extui %225 : vector<1x1x256xi1> to vector<1x1x256xi32>
    %227 = arith.sitofp %226 : vector<1x1x256xi32> to vector<1x1x256xf32>
    %228 = arith.truncf %227 : vector<1x1x256xf32> to vector<1x1x256xbf16>
    %229 = vector.broadcast %228 : vector<1x1x256xbf16> to vector<2x4x256xbf16>
    %230 = arith.mulf %216, %229 : vector<2x4x256xbf16>
    %cst_70 = arith.constant 0.000000e+00 : bf16
    %231 = vector.broadcast %cst_70 : bf16 to vector<2x4x1xbf16>
    %232 = vector.extract_strided_slice %159 {offsets = [0, 0, 1], sizes = [2, 4, 255], strides = [1, 1, 1]} : vector<2x4x256xbf16> to vector<2x4x255xbf16>
    %233 = tpu.concatenate %232, %231 in 2 : vector<2x4x255xbf16>, vector<2x4x1xbf16> -> vector<2x4x256xbf16>
    %c1_i32_71 = arith.constant 1 : i32
    %234 = vector.broadcast %c1_i32_71 : i32 to vector<1x1x256xi32>
    %235 = arith.addi %176, %234 : vector<1x1x256xi32>
    %c0_i32_72 = arith.constant 0 : i32
    %236 = vector.broadcast %c0_i32_72 : i32 to vector<1x1x256xi32>
    %237 = arith.cmpi sge, %235, %236 : vector<1x1x256xi32>
    %c1_i32_73 = arith.constant 1 : i32
    %238 = vector.broadcast %c1_i32_73 : i32 to vector<1x1x256xi32>
    %239 = arith.addi %176, %238 : vector<1x1x256xi32>
    %c16_i32_74 = arith.constant 16 : i32
    %240 = vector.broadcast %c16_i32_74 : i32 to vector<1x1x256xi32>
    %241 = arith.cmpi slt, %239, %240 : vector<1x1x256xi32>
    %242 = arith.andi %237, %241 : vector<1x1x256xi1>
    %243 = arith.extui %242 : vector<1x1x256xi1> to vector<1x1x256xi32>
    %244 = arith.sitofp %243 : vector<1x1x256xi32> to vector<1x1x256xf32>
    %245 = arith.truncf %244 : vector<1x1x256xf32> to vector<1x1x256xbf16>
    %246 = vector.broadcast %245 : vector<1x1x256xbf16> to vector<2x4x256xbf16>
    %247 = arith.mulf %233, %246 : vector<2x4x256xbf16>
    %cst_75 = arith.constant 0.000000e+00 : bf16
    %248 = vector.broadcast %cst_75 : bf16 to vector<2x4x15xbf16>
    %249 = vector.extract_strided_slice %159 {offsets = [0, 0, 15], sizes = [2, 4, 241], strides = [1, 1, 1]} : vector<2x4x256xbf16> to vector<2x4x241xbf16>
    %250 = tpu.concatenate %249, %248 in 2 : vector<2x4x241xbf16>, vector<2x4x15xbf16> -> vector<2x4x256xbf16>
    %c-1_i32_76 = arith.constant -1 : i32
    %251 = vector.broadcast %c-1_i32_76 : i32 to vector<1x1x256xi32>
    %252 = arith.addi %176, %251 : vector<1x1x256xi32>
    %c0_i32_77 = arith.constant 0 : i32
    %253 = vector.broadcast %c0_i32_77 : i32 to vector<1x1x256xi32>
    %254 = arith.cmpi sge, %252, %253 : vector<1x1x256xi32>
    %c-1_i32_78 = arith.constant -1 : i32
    %255 = vector.broadcast %c-1_i32_78 : i32 to vector<1x1x256xi32>
    %256 = arith.addi %176, %255 : vector<1x1x256xi32>
    %c16_i32_79 = arith.constant 16 : i32
    %257 = vector.broadcast %c16_i32_79 : i32 to vector<1x1x256xi32>
    %258 = arith.cmpi slt, %256, %257 : vector<1x1x256xi32>
    %259 = arith.andi %254, %258 : vector<1x1x256xi1>
    %260 = arith.extui %259 : vector<1x1x256xi1> to vector<1x1x256xi32>
    %261 = arith.sitofp %260 : vector<1x1x256xi32> to vector<1x1x256xf32>
    %262 = arith.truncf %261 : vector<1x1x256xf32> to vector<1x1x256xbf16>
    %263 = vector.broadcast %262 : vector<1x1x256xbf16> to vector<2x4x256xbf16>
    %264 = arith.mulf %250, %263 : vector<2x4x256xbf16>
    %cst_80 = arith.constant 0.000000e+00 : bf16
    %265 = vector.broadcast %cst_80 : bf16 to vector<2x4x16xbf16>
    %266 = vector.extract_strided_slice %159 {offsets = [0, 0, 16], sizes = [2, 4, 240], strides = [1, 1, 1]} : vector<2x4x256xbf16> to vector<2x4x240xbf16>
    %267 = tpu.concatenate %266, %265 in 2 : vector<2x4x240xbf16>, vector<2x4x16xbf16> -> vector<2x4x256xbf16>
    %cst_81 = arith.constant 0.000000e+00 : bf16
    %268 = vector.broadcast %cst_81 : bf16 to vector<2x4x17xbf16>
    %269 = vector.extract_strided_slice %159 {offsets = [0, 0, 17], sizes = [2, 4, 239], strides = [1, 1, 1]} : vector<2x4x256xbf16> to vector<2x4x239xbf16>
    %270 = tpu.concatenate %269, %268 in 2 : vector<2x4x239xbf16>, vector<2x4x17xbf16> -> vector<2x4x256xbf16>
    %c1_i32_82 = arith.constant 1 : i32
    %271 = vector.broadcast %c1_i32_82 : i32 to vector<1x1x256xi32>
    %272 = arith.addi %176, %271 : vector<1x1x256xi32>
    %c0_i32_83 = arith.constant 0 : i32
    %273 = vector.broadcast %c0_i32_83 : i32 to vector<1x1x256xi32>
    %274 = arith.cmpi sge, %272, %273 : vector<1x1x256xi32>
    %c1_i32_84 = arith.constant 1 : i32
    %275 = vector.broadcast %c1_i32_84 : i32 to vector<1x1x256xi32>
    %276 = arith.addi %176, %275 : vector<1x1x256xi32>
    %c16_i32_85 = arith.constant 16 : i32
    %277 = vector.broadcast %c16_i32_85 : i32 to vector<1x1x256xi32>
    %278 = arith.cmpi slt, %276, %277 : vector<1x1x256xi32>
    %279 = arith.andi %274, %278 : vector<1x1x256xi1>
    %280 = arith.extui %279 : vector<1x1x256xi1> to vector<1x1x256xi32>
    %281 = arith.sitofp %280 : vector<1x1x256xi32> to vector<1x1x256xf32>
    %282 = arith.truncf %281 : vector<1x1x256xf32> to vector<1x1x256xbf16>
    %283 = vector.broadcast %282 : vector<1x1x256xbf16> to vector<2x4x256xbf16>
    %284 = arith.mulf %270, %283 : vector<2x4x256xbf16>
    %285 = tpu.concatenate %193, %196, %213, %230, %159, %247, %264, %267, %284 in 1 : vector<2x4x256xbf16>, vector<2x4x256xbf16>, vector<2x4x256xbf16>, vector<2x4x256xbf16>, vector<2x4x256xbf16>, vector<2x4x256xbf16>, vector<2x4x256xbf16>, vector<2x4x256xbf16>, vector<2x4x256xbf16> -> vector<2x36x256xbf16>
    %c0_86 = arith.constant 0 : index
    %c0_87 = arith.constant 0 : index
    %286 = vector.load %arg4[%c0_86, %c0_87] : memref<4x36xbf16, #tpu.memory_space<vmem>>, vector<4x36xbf16>
    %287 = vector.shape_cast %286 : vector<4x36xbf16> to vector<1x4x36xbf16>
    %288 = vector.broadcast %287 : vector<1x4x36xbf16> to vector<2x4x36xbf16>
    "tpu.trace_start"() <{level = 10 : i32, message = "nok,nkp->nop"}> : () -> ()
    %cst_88 = arith.constant dense<0.000000e+00> : vector<2x4x256xf32>
    %289 = tpu.matmul %288, %285, %cst_88 {dimension_numbers = #tpu.dot_dimension_numbers<[2], [1], [1], [2], [0, 0, 0, 1, 1, 2], [0], [0]>} : vector<2x4x36xbf16>, vector<2x36x256xbf16>, vector<2x4x256xf32> -> vector<2x4x256xf32>
    "tpu.trace_stop"() : () -> ()
    %cst_89 = arith.constant dense<0.000000e+00> : vector<4xf32>
    %290 = vector.multi_reduction <add>, %289, %cst_89 [0, 2] : vector<2x4x256xf32> to vector<4xf32>
    %291 = vector.shape_cast %290 : vector<4xf32> to vector<1x4x1xf32>
    %292 = arith.mulf %289, %289 : vector<2x4x256xf32>
    %cst_90 = arith.constant dense<0.000000e+00> : vector<4xf32>
    %293 = vector.multi_reduction <add>, %292, %cst_90 [0, 2] : vector<2x4x256xf32> to vector<4xf32>
    %294 = vector.shape_cast %293 : vector<4xf32> to vector<1x4x1xf32>
    %cst_91 = arith.constant 0.001953125 : f32
    %295 = vector.broadcast %cst_91 : f32 to vector<1x4x1xf32>
    %296 = arith.mulf %291, %295 : vector<1x4x1xf32>
    %cst_92 = arith.constant 0.001953125 : f32
    %297 = vector.broadcast %cst_92 : f32 to vector<1x4x1xf32>
    %298 = arith.mulf %294, %297 : vector<1x4x1xf32>
    %299 = arith.mulf %296, %296 : vector<1x4x1xf32>
    %300 = arith.subf %298, %299 : vector<1x4x1xf32>
    %c0_93 = arith.constant 0 : index
    %c0_94 = arith.constant 0 : index
    %301 = vector.load %arg5[%c0_93, %c0_94] : memref<4x1xf32, #tpu.memory_space<vmem>>, vector<4x1xf32>
    %cst_95 = arith.constant 9.99999974E-6 : f32
    %302 = vector.broadcast %cst_95 : f32 to vector<1x4x1xf32>
    %303 = arith.addf %300, %302 : vector<1x4x1xf32>
    %304 = math.rsqrt %303 : vector<1x4x1xf32>
    %305 = vector.shape_cast %301 : vector<4x1xf32> to vector<1x4x1xf32>
    %306 = arith.mulf %305, %304 : vector<1x4x1xf32>
    %c0_96 = arith.constant 0 : index
    %c0_97 = arith.constant 0 : index
    %307 = vector.load %arg6[%c0_96, %c0_97] : memref<4x1xf32, #tpu.memory_space<vmem>>, vector<4x1xf32>
    %308 = arith.mulf %296, %306 : vector<1x4x1xf32>
    %309 = vector.shape_cast %307 : vector<4x1xf32> to vector<1x4x1xf32>
    %310 = arith.subf %309, %308 : vector<1x4x1xf32>
    %311 = vector.broadcast %306 : vector<1x4x1xf32> to vector<2x4x256xf32>
    %312 = arith.mulf %289, %311 : vector<2x4x256xf32>
    %313 = vector.broadcast %310 : vector<1x4x1xf32> to vector<2x4x256xf32>
    %314 = arith.addf %312, %313 : vector<2x4x256xf32>
    %315 = arith.addf %314, %0 : vector<2x4x256xf32>
    %cst_98 = arith.constant 0.000000e+00 : f32
    %316 = vector.broadcast %cst_98 : f32 to vector<2x4x256xf32>
    %317 = arith.maximumf %315, %316 : vector<2x4x256xf32>
    %c0_99 = arith.constant 0 : index
    %c0_100 = arith.constant 0 : index
    %c0_101 = arith.constant 0 : index
    %318 = vector.load %arg7[%c0_99, %c0_100, %c0_101] : memref<2x4x256xf32, #tpu.memory_space<vmem>>, vector<2x4x256xf32>
    tpu.vector_store %arg7[%c0_99, %c0_100, %c0_101], %317 {strides = array<i32>} : memref<2x4x256xf32, #tpu.memory_space<vmem>>, vector<2x4x256xf32>,
    return
  }
}

</mosaic_0001>

<bundles_post_ra>
// kernel: basic_block_forward.1
= control target key start
LH: loop header
LB: loop body
LE: loop exit
PB: predicated region body
PF: predicated region fallthrough
CT: control target
= control target key end

     0   :  { %s1019_s26 = smov 111   ;;  %s1020_s27 = smov 127   ;;  %v1027_v8 = vmov 0   ;;  %v39_v9 = vlaneseq  ;;  %v1028_v17 = vmov 0.0   ;;  %vm219_vm2 = vcmask 924672   ;;  %s1480_s0 = inlined_call_operand.vmem [shape: f32[2,4,256], index: 0, kind: input, shape index: {}]   ;;  %s1481_s1 = inlined_call_operand.vmem [shape: bf16[4,36], index: 1, kind: input, shape index: {}]   ;;  %s1482_s2 = inlined_call_operand.vmem [shape: f32[4,1], index: 2, kind: input, shape index: {}]   ;;  %s1483_s3 = inlined_call_operand.vmem [shape: f32[4,1], index: 3, kind: input, shape index: {}]   ;;  %s1484_s4 = inlined_call_operand.vmem [shape: bf16[4,36], index: 4, kind: input, shape index: {}]   ;;  %s1485_s5 = inlined_call_operand.vmem [shape: f32[4,1], index: 5, kind: input, shape index: {}]   ;;  %s1486_s6 = inlined_call_operand.vmem [shape: f32[4,1], index: 6, kind: input, shape index: {}]   ;;  %s1487_s7 = inlined_call_operand.vmem [shape: f32[2,4,256], index: 7, kind: output, shape index: {}]  }
   0x1   :  { %v27_v0 = vld [vmem:[%s1480_s0] sm:$0xff]  ;;  %v28_v4 = vld [vmem:[%s1480_s0 + $0x8] sm:$0xff]  ;;  %s1021_s30 = smov 113   ;;  %s1022_s8 = smov 112   ;;  %429 = vmatprep.mubr.bf16.mxu0 %v1027_v8  ;;  %476 = vmatprep.mubr.bf16.mxu1 %v1027_v8  ;;  %vm195_vm4 = vcmask 1039360   ;;  %vm259_vm5 = vcmask 908288  }
   0x2   :  { %v1072_v1 = vpack.c.bf16 %v27_v0, %v27_v0  ;;  %v1074_v2 = vcombine.high %v27_v0, %v27_v0  ;;  %v1091_v5 = vcombine.high %v28_v4, %v28_v4  ;;  %s1023_s9 = smov 15   ;;  %v1109_v7 = vpack.c.bf16 %v28_v4, %v28_v4  ;;  %s1024_s10 = smov 17   ;;  %1009 = vset.pattern.permute.xlu0 %v1027_v8 }
   0x3   :  { %s1025_s11 = smov 16   ;;  %s1026_s12 = smov 1   ;;  %1010 = vset.pattern.permute.xlu1 %v1027_v8  ;;  %v40_v10 = vand.u32 127, %v39_v9  ;;  %vm319_vm7 = vcmask 1041408   ;;  %vm243_vm8 = vcmask 916480   ;;  %vm332_vm9 = vcmask 1043456  }
   0x4   :  { %251 = vrot.lane.b32.xlu1 %v1072_v1, %s1019_s26  ;;  %187 = vrot.lane.b32.xlu0 %v1072_v1, %s1020_s27  ;;  %v1082_v3 = vpack.c.bf16 %v1074_v2, %v1074_v2  ;;  %v1099_v6 = vpack.c.bf16 %v1091_v5, %v1091_v5  ;;  %vm341_vm10 = vcmask 1045504   ;;  %vm133_vm11 = vcmask 121856  }
   0x5   :  { %v41_v11 = vadd.s32 128, %v40_v10  ;;  %v46_v15 = vand.u32 15, %v40_v10  ;;  %vm117_vm12 = vcmask 130048   ;;  %vm171_vm13 = vcmask 7168  }
   0x6   :  { %vm78_vm14 = vcmask 138240   ;;  %vm387_vm15 = vcmask 293888  }
   0x7   :  { %v53_v12 = vand.u32 15, %v41_v11  ;;  %v145_v16 = vadd.s32 1, %v46_v15  ;;  %v91_v29 = vadd.s32 4294967295, %v46_v15 }
   0x8   :  { %213 = vrot.lane.b32.xlu1 %v1082_v3, %s1021_s30  ;;  %189 = vrot.lane.b32.xlu0 %v1082_v3, %s1020_s27 }
   0x9   :  { %v146_v13 = vadd.s32 1, %v53_v12  ;;  %v92_v14 = vadd.s32 4294967295, %v53_v12  ;;  %vm149_vm3 = vcmp.lt.s32.totalorder %v145_v16, 16  ;;  %vm93_vm6 = vcmp.ge.s32.totalorder %v91_v29, 0 }
   0xa   :  { %v989_v27 = vsel %vm149_vm3, 1.0, %v1028_v17  ;;  %v987_v41 = vsel %vm93_vm6, 1.0, %v1028_v17 }
   0xb   :  { %vm150_vm0 = vcmp.lt.s32.totalorder %v146_v13, 16  ;;  %vm94_vm1 = vcmp.ge.s32.totalorder %v92_v14, 0  ;;  %v1167_v32 = vpack.c.bf16 %v989_v27, %v989_v27  ;;  %v1179_v49 = vpack.c.bf16 %v987_v41, %v987_v41 }
   0xc   :  { %211 = vrot.lane.b32.xlu1 %v1072_v1, %s1021_s30  ;;  %253 = vrot.lane.b32.xlu0 %v1082_v3, %s1019_s26  ;;  %v990_v18 = vsel %vm150_vm0, 1.0, %v1028_v17  ;;  %v988_v21 = vsel %vm94_vm1, 1.0, %v1028_v17 }
   0xd   :  { %v1159_v22 = vpack.c.bf16 %v990_v18, %v990_v18  ;;  %v1161_v23 = vpack.c.bf16 %v988_v21, %v988_v21 }
  0x10   :  { %237 = vrot.lane.b32.xlu1 %v1082_v3, %s1022_s8  ;;  %193 = vrot.lane.b32.xlu0 %v1099_v6, %s1020_s27 }
  0x14   :  { %127 = vrot.lane.b32.xlu1 %v1082_v3, %s1023_s9  ;;  %125 = vrot.lane.b32.xlu0 %v1072_v1, %s1023_s9 }
  0x18   :  { %217 = vrot.lane.b32.xlu1 %v1099_v6, %s1021_s30  ;;  %191 = vrot.lane.b32.xlu0 %v1109_v7, %s1020_s27 }
  0x1c   :  { %255 = vrot.lane.b32.xlu1 %v1109_v7, %s1019_s26  ;;  %235 = vrot.lane.b32.xlu0 %v1072_v1, %s1022_s8 }
  0x20   :  { %70 = vrot.lane.b32.xlu1 %v1072_v1, %s1024_s10  ;;  %257 = vrot.lane.b32.xlu0 %v1099_v6, %s1019_s26 }
  0x24   :  { %109 = vrot.lane.b32.xlu1 %v1072_v1, %s1025_s11  ;;  %72 = vrot.lane.b32.xlu0 %v1082_v3, %s1024_s10 }
  0x28   :  { %163 = vrot.lane.b32.xlu1 %v1072_v1, %s1026_s12  ;;  %111 = vrot.lane.b32.xlu0 %v1082_v3, %s1025_s11 }
  0x2c   :  { %215 = vrot.lane.b32.xlu1 %v1109_v7, %s1021_s30  ;;  %165 = vrot.lane.b32.xlu0 %v1082_v3, %s1026_s12 }
  0x30   :  { %129 = vrot.lane.b32.xlu1 %v1109_v7, %s1023_s9  ;;  %241 = vrot.lane.b32.xlu0 %v1099_v6, %s1022_s8 }
  0x34   :  { %239 = vrot.lane.b32.xlu1 %v1109_v7, %s1022_s8  ;;  %131 = vrot.lane.b32.xlu0 %v1099_v6, %s1023_s9 }
  0x38   :  { %76 = vrot.lane.b32.xlu1 %v1099_v6, %s1024_s10  ;;  %74 = vrot.lane.b32.xlu0 %v1109_v7, %s1024_s10 }
  0x3c   :  { %115 = vrot.lane.b32.xlu1 %v1099_v6, %s1025_s11  ;;  %113 = vrot.lane.b32.xlu0 %v1109_v7, %s1025_s11 }
  0x40   :  { %169 = vrot.lane.b32.xlu1 %v1099_v6, %s1026_s12  ;;  %167 = vrot.lane.b32.xlu0 %v1109_v7, %s1026_s12 }
  0x76   :  { %v252_v19 = vpop.permute.xlu1 %251  ;;  %v188_v20 = vpop.permute.xlu0 %187 }
  0x7a   :  { %v214_v24 = vpop.permute.xlu1 %213  ;;  %v190_v25 = vpop.permute.xlu0 %189 }
  0x7b   :  { %v226_v26 = vsel %vm219_vm2, %v214_v24, 0  ;;  %v202_v28 = vsel %vm195_vm4, %v190_v25, 0  ;;  %v196_v48 = vsel %vm195_vm4, %v188_v20, %v190_v25 }
  0x7c   :  { %v208_v30 = vmul.bf16 %v202_v28, %v1159_v22  ;;  %v232_v31 = vmul.bf16 %v226_v26, %v1161_v23  ;;  %v207_v55 = vmul.bf16 %v196_v48, %v1167_v32 }
  0x7e   :  { %v302_v33 = vrot.slane %v208_v30, 6  ;;  %v212_v34 = vpop.permute.xlu1 %211  ;;  %v254_v35 = vpop.permute.xlu0 %253  ;;  %v310_v40 = vrot.slane %v232_v31, 4  ;;  %v301_v59 = vrot.slane %v207_v55, 6 }
  0x7f   :  { %v260_v36 = vsel %vm259_vm5, %v252_v19, %v254_v35  ;;  %v266_v37 = vsel %vm259_vm5, %v254_v35, 0  ;;  %v220_v51 = vsel %vm219_vm2, %v212_v34, %v214_v24 }
  0x80   :  { %v272_v38 = vmul.bf16 %v266_v37, %v1159_v22  ;;  %v271_v39 = vmul.bf16 %v260_v36, %v1167_v32  ;;  %v359_v45 = vsel %vm319_vm7, %v1082_v3, %v302_v33  ;;  %v231_v56 = vmul.bf16 %v220_v51, %v1179_v49 }
  0x81   :  { %v369_v50 = vsel %vm332_vm9, %v359_v45, %v310_v40  ;;  %v356_v3 = vsel %vm319_vm7, %v1072_v1, %v301_v59 }
  0x82   :  { %v238_v42 = vpop.permute.xlu1 %237  ;;  %991 = vmatprep.subr.msk.bf16.mxu0 %vm319_vm7, %v272_v38  ;;  %v194_v43 = vpop.permute.xlu0 %193  ;;  %v392_v44 = vsel %vm319_vm7, %v271_v39, 0  ;;  %v309_v60 = vrot.slane %v231_v56, 4 }
  0x83   :  { %v248_v46 = vsel %vm243_vm8, %v238_v42, 0  ;;  %408 = vmatpush1.bf16.msra.mxu0 %v392_v44  ;;  %v205_v18 = vsel %vm195_vm4, %v194_v43, 0 }
  0x84   :  { %v316_v47 = vrot.slane %v248_v46, 2  ;;  %v367_v4 = vsel %vm332_vm9, %v356_v3, %v309_v60  ;;  %v210_v20 = vmul.bf16 %v205_v18, %v1159_v22 }
  0x86   :  { %v128_v52 = vpop.permute.xlu1 %127  ;;  %v126_v53 = vpop.permute.xlu0 %125  ;;  %v378_v54 = vsel %vm341_vm10, %v369_v50, %v316_v47  ;;  %v304_v44 = vrot.slane %v210_v20, 6 }
  0x87   :  { %409 = vmatprep.subr.bf16.mxu0 %v378_v54  ;;  %v134_v19 = vsel %vm133_vm11, %v126_v53, %v128_v52  ;;  %v140_v27 = vsel %vm133_vm11, 0, %v126_v53 }
  0x88   :  { %v160_v31 = vmul.bf16 %v1159_v22, %v134_v19  ;;  %v159_v39 = vmul.bf16 %v1167_v32, %v140_v27 }
  0x8a   :  { %v218_v57 = vpop.permute.xlu1 %217  ;;  %v192_v58 = vpop.permute.xlu0 %191  ;;  %v286_v48 = vrot.slane %v160_v31, 4  ;;  %v285_v56 = vrot.slane %v159_v39, 4 }
  0x8b   :  { %v229_v21 = vsel %vm219_vm2, %v218_v57, 0  ;;  %v197_v36 = vsel %vm195_vm4, %v192_v58, %v194_v43 }
  0x8c   :  { %v234_v35 = vmul.bf16 %v229_v21, %v1161_v23  ;;  %v209_v50 = vmul.bf16 %v197_v36, %v1167_v32 }
  0x8e   :  { %v256_v61 = vpop.permute.xlu1 %255  ;;  %v236_v62 = vpop.permute.xlu0 %235  ;;  %v312_v52 = vrot.slane %v234_v35, 4 }
  0x8f   :  { %v244_v63 = vsel %vm243_vm8, %v236_v62, %v238_v42  ;;  %v365_v62 = vsel %vm319_vm7, %v1099_v6, %v304_v44  ;;  %v386_v6 = vld [vmem:[%s1481_s1] sm:$0x3] }
  0x90   :  { %v315_v0 = vrot.slane %v244_v63, 2  ;;  %v303_v63 = vrot.slane %v209_v50, 6 }
  0x92   :  { %v71_v9 = vpop.permute.xlu1 %70  ;;  %v258_v10 = vpop.permute.xlu0 %257  ;;  %v375_v11 = vsel %vm341_vm10, %v367_v4, %v315_v0 }
  0x93   :  { %v261_v12 = vsel %vm259_vm5, %v256_v61, %v258_v10  ;;  %v269_v13 = vsel %vm259_vm5, %v258_v10, 0  ;;  %410 = vmatpush1.bf16.msra.mxu0 %v375_v11  ;;  %v86_v33 = vsel %vm78_vm14, 0, %v71_v9  ;;  %v373_v11 = vsel %vm332_vm9, %v365_v62, %v312_v52 }
  0x94   :  { %v274_v14 = vmul.bf16 %v269_v13, %v1159_v22  ;;  %v273_v15 = vmul.bf16 %v261_v12, %v1167_v32  ;;  %v105_v45 = vmul.bf16 %v1179_v49, %v86_v33 }
  0x96   :  { %v110_v16 = vpop.permute.xlu1 %109  ;;  %993 = vmatprep.subr.msk.bf16.mxu1 %vm319_vm7, %v274_v14  ;;  %v73_v1 = vpop.permute.xlu0 %72  ;;  %v439_v17 = vsel %vm319_vm7, %v273_v15, 0 }
  0x97   :  { %455 = vmatpush1.bf16.msra.mxu1 %v439_v17  ;;  %v122_v24 = vsel %vm117_vm12, 0, %v110_v16  ;;  %v79_v28 = vsel %vm78_vm14, %v71_v9, %v73_v1  ;;  %v362_v1 = vsel %vm319_vm7, %v1109_v7, %v303_v63 }
  0x98   :  { %v277_v37 = vrot.slane %v122_v24, 6  ;;  %v106_v40 = vmul.bf16 %v1161_v23, %v79_v28 }
  0x9a   :  { %v164_v25 = vpop.permute.xlu1 %163  ;;  %v112_v26 = vpop.permute.xlu0 %111  ;;  %v322_v55 = vsel %vm319_vm7, %v105_v45, %v277_v37 }
  0x9b   :  { %v178_v29 = vsel %vm171_vm13, 0, %v164_v25  ;;  %v118_v30 = vsel %vm117_vm12, %v110_v16, %v112_v26  ;;  %v334_v4 = vsel %vm332_vm9, %v322_v55, %v285_v56 }
  0x9c   :  { %v278_v34 = vrot.slane %v118_v30, 6  ;;  %v183_v38 = vmul.bf16 %v178_v29, %v1179_v49 }
  0x9e   :  { %v216_v41 = vpop.permute.xlu1 %215  ;;  %v166_v42 = vpop.permute.xlu0 %165  ;;  %v325_v51 = vsel %vm319_vm7, %v106_v40, %v278_v34  ;;  %v293_v53 = vrot.slane %v183_v38, 2 }
  0x9f   :  { %v221_v46 = vsel %vm219_vm2, %v216_v41, %v218_v57  ;;  %v172_v47 = vsel %vm171_vm13, %v164_v25, %v166_v42  ;;  %v336_v61 = vsel %vm332_vm9, %v325_v51, %v286_v48 }
  0xa0   :  { %v184_v43 = vmul.bf16 %v172_v47, %v1161_v23  ;;  %v233_v54 = vmul.bf16 %v221_v46, %v1179_v49  ;;  %v343_v10 = vsel %vm341_vm10, %v334_v4, %v293_v53 }
  0xa2   :  { %v294_v58 = vrot.slane %v184_v43, 2  ;;  %v130_v59 = vpop.permute.xlu1 %129  ;;  %v242_v60 = vpop.permute.xlu0 %241  ;;  %v311_v9 = vrot.slane %v233_v54, 4 }
  0xa3   :  { %v250_v57 = vsel %vm243_vm8, %v242_v60, 0  ;;  %v143_v21 = vsel %vm133_vm11, 0, %v130_v59 }
  0xa4   :  { %v318_v0 = vrot.slane %v250_v57, 2  ;;  %v346_v3 = vsel %vm341_vm10, %v336_v61, %v294_v58  ;;  %v371_v17 = vsel %vm332_vm9, %v362_v1, %v311_v9  ;;  %v161_v33 = vmul.bf16 %v1167_v32, %v143_v21 }
  0xa5   :  { %411 = vmatprep.subr.bf16.mxu0 %v346_v3 }
  0xa6   :  { %v240_v12 = vpop.permute.xlu1 %239  ;;  %412 = vmatpush1.bf16.msra.mxu0 %v343_v10  ;;  %v132_v13 = vpop.permute.xlu0 %131  ;;  %v384_v14 = vsel %vm341_vm10, %v373_v11, %v318_v0  ;;  %v287_v46 = vrot.slane %v161_v33, 4 }
  0xa7   :  { %v245_v15 = vsel %vm243_vm8, %v240_v12, %v242_v60  ;;  %456 = vmatprep.subr.bf16.mxu1 %v384_v14  ;;  %v135_v24 = vsel %vm133_vm11, %v130_v59, %v132_v13 }
  0xa8   :  { %v317_v16 = vrot.slane %v245_v15, 2  ;;  %v162_v34 = vmul.bf16 %v1159_v22, %v135_v24 }
  0xa9   :  { %992 = vmatmul.mubr.msk.bf16.vlgmr.msra.gmra.mxu0 %vm387_vm15, %v386_v6 }
  0xaa   :  { %v77_v18 = vpop.permute.xlu1 %76  ;;  %v75_v19 = vpop.permute.xlu0 %74  ;;  %v381_v20 = vsel %vm341_vm10, %v371_v17, %v317_v16  ;;  %858 = vmatprep.mubr.bf16.mxu0 %v1027_v8  ;;  %v288_v47 = vrot.slane %v162_v34, 4 }
  0xab   :  { %457 = vmatpush1.bf16.msra.mxu1 %v381_v20  ;;  %v80_v27 = vsel %vm78_vm14, %v75_v19, %v77_v18  ;;  %v89_v7 = vsel %vm78_vm14, 0, %v75_v19 }
  0xac   :  { %v107_v35 = vmul.bf16 %v1179_v49, %v89_v7  ;;  %v108_v36 = vmul.bf16 %v1161_v23, %v80_v27  ;;  %v511_v7 = vld [vmem:[%s1482_s2] sm:$0xf] }
  0xae   :  { %v116_v25 = vpop.permute.xlu1 %115  ;;  %v114_v26 = vpop.permute.xlu0 %113 }
  0xaf   :  { %v119_v28 = vsel %vm117_vm12, %v114_v26, %v116_v25  ;;  %v124_v29 = vsel %vm117_vm12, 0, %v114_v26 }
  0xb0   :  { %v279_v30 = vrot.slane %v124_v29, 6  ;;  %v280_v31 = vrot.slane %v119_v28, 6 }
  0xb2   :  { %v170_v37 = vpop.permute.xlu1 %169  ;;  %v168_v38 = vpop.permute.xlu0 %167  ;;  %v331_v44 = vsel %vm319_vm7, %v108_v36, %v280_v31  ;;  %v328_v45 = vsel %vm319_vm7, %v107_v35, %v279_v30  ;;  %v515_v30 = vld [vmem:[%s1483_s3] sm:$0xf] }
  0xb3   :  { %v173_v39 = vsel %vm171_vm13, %v168_v38, %v170_v37  ;;  %v181_v40 = vsel %vm171_vm13, 0, %v168_v38  ;;  %v340_v43 = vsel %vm332_vm9, %v331_v44, %v288_v47  ;;  %v338_v51 = vsel %vm332_vm9, %v328_v45, %v287_v46 }
  0xb4   :  { %v185_v41 = vmul.bf16 %v181_v40, %v1179_v49  ;;  %v186_v42 = vmul.bf16 %v173_v39, %v1161_v23 }
  0xb6   :  { %v295_v48 = vrot.slane %v185_v41, 2  ;;  %v296_v50 = vrot.slane %v186_v42, 2 }
  0xb8   :  { %v352_v52 = vsel %vm341_vm10, %v340_v43, %v296_v50  ;;  %v349_v53 = vsel %vm341_vm10, %v338_v51, %v295_v48 }
  0xb9   :  { %458 = vmatprep.subr.bf16.mxu1 %v352_v52 }
  0xba   :  { %459 = vmatpush1.bf16.msra.mxu1 %v349_v53 }
  0xbd   :  { %994 = vmatmul.mubr.msk.bf16.vlgmr.msra.gmra.mxu1 %vm387_vm15, %v386_v6 }
  0xbe   :  { %905 = vmatprep.mubr.bf16.mxu1 %v1027_v8 }
 0x169   :  { %v431_v54 = vpop.f32.mrf.mxu0 }
 0x16a   :  { %v494_v59 = vmul.f32 %v431_v54, %v431_v54  ;;  %v485_v57 = vsel %vm332_vm9, %v431_v54, 0.0 }
 0x16b   :  { %v433_v55 = vpop.f32.mrf.mxu0 }
 0x16c   :  { %v495_v60 = vmul.f32 %v433_v55, %v433_v55  ;;  %v486_v61 = vsel %vm332_vm9, %v433_v55, 0.0  ;;  %v498_v62 = vsel %vm332_vm9, %v494_v59, 0.0 }
 0x16d   :  { %v435_v56 = vpop.f32.mrf.mxu0  ;;  %v487_v0 = vadd.f32 %v486_v61, %v485_v57 }
 0x16e   :  { %v499_v63 = vsel %vm332_vm9, %v495_v60, 0.0 }
 0x16f   :  { %v436_v58 = vpop.f32.mrf.mxu0  ;;  %v500_v11 = vadd.f32 %v499_v63, %v498_v62 }
 0x17d   :  { %v478_v3 = vpop.f32.mrf.mxu1 }
 0x17e   :  { %v488_v4 = vsel %vm332_vm9, %v478_v3, 0.0  ;;  %v496_v9 = vmul.f32 %v478_v3, %v478_v3 }
 0x17f   :  { %v480_v8 = vpop.f32.mrf.mxu1  ;;  %v489_v10 = vadd.f32 %v488_v4, %v487_v0 }
 0x180   :  { %v497_v12 = vmul.f32 %v480_v8, %v480_v8  ;;  %v490_v13 = vsel %vm332_vm9, %v480_v8, 0.0  ;;  %v501_v14 = vsel %vm332_vm9, %v496_v9, 0.0 }
 0x181   :  { %v482_v6 = vpop.f32.mrf.mxu1  ;;  %v491_v15 = vadd.f32 %v490_v13, %v489_v10  ;;  %v502_v16 = vadd.f32 %v501_v14, %v500_v11 }
 0x182   :  { %v503_v1 = vsel %vm332_vm9, %v497_v12, 0.0 }
 0x183   :  { %492 = vadd.xlane.f32.xlu0 %v491_v15  ;;  %v483_v17 = vpop.f32.mrf.mxu1  ;;  %v504_v18 = vadd.f32 %v503_v1, %v502_v16 }
 0x185   :  { %505 = vadd.xlane.f32.xlu1 %v504_v18 }
 0x20c   :  { %v493_v19 = vpop.xlane.xlu0 %492 }
 0x20d   :  { %v507_v20 = vmul.f32 0.001953125, %v493_v19 }
 0x20e   :  { %v506_v21 = vpop.xlane.xlu1 %505 }
 0x20f   :  { %v509_v24 = vmul.f32 %v507_v20, %v507_v20  ;;  %v508_v25 = vmul.f32 0.001953125, %v506_v21 }
 0x211   :  { %v510_v26 = vsub.f32 %v508_v25, %v509_v24 }
 0x213   :  { %v512_v27 = vadd.f32 1e-05, %v510_v26 }
 0x215   :  { %1013 = vrsqrt.f32 %v512_v27 }
 0x222   :  { %v1014_v28 = vpop.eup %1013 }
 0x223   :  { %v514_v29 = vmul.f32 %v1014_v28, %v511_v7 }
 0x225   :  { %520 = vperm.xlu0 %1009, %v514_v29   ;;  %v516_v31 = vmul.f32 %v514_v29, %v507_v20 }
 0x227   :  { %v517_v33 = vsub.f32 %v515_v30, %v516_v31 }
 0x229   :  { %529 = vperm.xlu1 %1010, %v517_v33  }
 0x2a0   :  { %v521_v34 = vpop.permute.xlu0 %520 }
 0x2a1   :  { %v523_v35 = vmul.f32 %v521_v34, %v431_v54  ;;  %v524_v36 = vmul.f32 %v521_v34, %v433_v55  ;;  %v526_v37 = vmul.f32 %v521_v34, %v480_v8  ;;  %v525_v42 = vmul.f32 %v521_v34, %v478_v3 }
 0x2a4   :  { %v530_v38 = vpop.permute.xlu1 %529 }
 0x2a5   :  { %v532_v39 = vadd.f32 %v530_v38, %v523_v35  ;;  %v533_v40 = vadd.f32 %v530_v38, %v524_v36  ;;  %v535_v41 = vadd.f32 %v530_v38, %v526_v37  ;;  %v534_v46 = vadd.f32 %v530_v38, %v525_v42 }
 0x2a7   :  { %v537_v44 = vmax.f32 %v533_v40, 0.0  ;;  %v539_v45 = vmax.f32 %v535_v41, 0.0  ;;  %v536_v47 = vmax.f32 %v532_v39, 0.0  ;;  %v538_v43 = vmax.f32 %v534_v46, 0.0 }
 0x2a9   :  { %v1276_v48 = vpack.c.bf16 %v537_v44, %v537_v44  ;;  %v1278_v50 = vpack.c.bf16 %v539_v45, %v539_v45  ;;  %v1284_v51 = vpack.c.bf16 %v536_v47, %v536_v47  ;;  %v1290_v52 = vpack.c.bf16 %v538_v43, %v538_v43 }
 0x2ab   :  { %634 = vrot.lane.b32.xlu0 %v1278_v50, %s1020_s27  ;;  %630 = vrot.lane.b32.xlu1 %v1276_v48, %s1020_s27 }
 0x2af   :  { %584 = vrot.lane.b32.xlu0 %v1284_v51, %s1023_s9  ;;  %628 = vrot.lane.b32.xlu1 %v1284_v51, %s1020_s27 }
 0x2b3   :  { %632 = vrot.lane.b32.xlu0 %v1290_v52, %s1020_s27  ;;  %652 = vrot.lane.b32.xlu1 %v1276_v48, %s1021_s30 }
 0x2b7   :  { %672 = vrot.lane.b32.xlu0 %v1284_v51, %s1022_s8  ;;  %686 = vrot.lane.b32.xlu1 %v1284_v51, %s1019_s26 }
 0x2bb   :  { %692 = vrot.lane.b32.xlu0 %v1278_v50, %s1019_s26  ;;  %688 = vrot.lane.b32.xlu1 %v1276_v48, %s1019_s26 }
 0x2bf   :  { %550 = vrot.lane.b32.xlu0 %v1276_v48, %s1024_s10  ;;  %650 = vrot.lane.b32.xlu1 %v1284_v51, %s1021_s30 }
 0x2c3   :  { %572 = vrot.lane.b32.xlu0 %v1276_v48, %s1025_s11  ;;  %674 = vrot.lane.b32.xlu1 %v1276_v48, %s1022_s8 }
 0x2c7   :  { %608 = vrot.lane.b32.xlu0 %v1276_v48, %s1026_s12  ;;  %586 = vrot.lane.b32.xlu1 %v1276_v48, %s1023_s9 }
 0x2cb   :  { %678 = vrot.lane.b32.xlu0 %v1278_v50, %s1022_s8  ;;  %656 = vrot.lane.b32.xlu1 %v1278_v50, %s1021_s30 }
 0x2cf   :  { %590 = vrot.lane.b32.xlu0 %v1278_v50, %s1023_s9  ;;  %690 = vrot.lane.b32.xlu1 %v1290_v52, %s1019_s26 }
 0x2d3   :  { %552 = vrot.lane.b32.xlu0 %v1290_v52, %s1024_s10  ;;  %548 = vrot.lane.b32.xlu1 %v1284_v51, %s1024_s10 }
 0x2d7   :  { %574 = vrot.lane.b32.xlu0 %v1290_v52, %s1025_s11  ;;  %570 = vrot.lane.b32.xlu1 %v1284_v51, %s1025_s11 }
 0x2db   :  { %610 = vrot.lane.b32.xlu0 %v1290_v52, %s1026_s12  ;;  %606 = vrot.lane.b32.xlu1 %v1284_v51, %s1026_s12 }
 0x2df   :  { %654 = vrot.lane.b32.xlu1 %v1290_v52, %s1021_s30 }
 0x2e3   :  { %588 = vrot.lane.b32.xlu1 %v1290_v52, %s1023_s9 }
 0x2e7   :  { %676 = vrot.lane.b32.xlu1 %v1290_v52, %s1022_s8 }
 0x2eb   :  { %554 = vrot.lane.b32.xlu1 %v1278_v50, %s1024_s10 }
 0x2ef   :  { %576 = vrot.lane.b32.xlu1 %v1278_v50, %s1025_s11 }
 0x2f3   :  { %612 = vrot.lane.b32.xlu1 %v1278_v50, %s1026_s12 }
 0x31d   :  { %v1348_v53 = vpop.permute.xlu0 %634  ;;  %v631_v54 = vpop.permute.xlu1 %630 }
 0x31e   :  { %v641_v62 = vsel %vm195_vm4, %v631_v54, 0  ;;  %v644_v27 = vsel %vm195_vm4, %v1348_v53, 0 }
 0x31f   :  { %v647_v11 = vmul.bf16 %v641_v62, %v1159_v22  ;;  %v649_v40 = vmul.bf16 %v644_v27, %v1159_v22 }
 0x321   :  { %v1350_v55 = vpop.permute.xlu0 %584  ;;  %v629_v56 = vpop.permute.xlu1 %628  ;;  %v735_v19 = vrot.slane %v647_v11, 6  ;;  %v737_v42 = vrot.slane %v649_v40, 6 }
 0x322   :  { %v636_v61 = vsel %vm195_vm4, %v629_v56, %v631_v54 }
 0x323   :  { %v646_v4 = vmul.bf16 %v636_v61, %v1167_v32  ;;  %v789_v33 = vsel %vm319_vm7, %v1276_v48, %v735_v19  ;;  %v795_v54 = vsel %vm319_vm7, %v1278_v50, %v737_v42 }
 0x325   :  { %v1352_v58 = vpop.permute.xlu0 %632  ;;  %v653_v59 = vpop.permute.xlu1 %652  ;;  %v734_v17 = vrot.slane %v646_v4, 6 }
 0x326   :  { %v663_v63 = vsel %vm219_vm2, %v653_v59, 0 }
 0x327   :  { %v669_v6 = vmul.bf16 %v663_v63, %v1161_v23  ;;  %v786_v7 = vsel %vm319_vm7, %v1284_v51, %v734_v17  ;;  %v597_v63 = vsel %vm133_vm11, 0, %v1350_v55 }
 0x329   :  { %v673_v60 = vpop.permute.xlu0 %672  ;;  %v687_v57 = vpop.permute.xlu1 %686  ;;  %v743_v21 = vrot.slane %v669_v6, 4 }
 0x32b   :  { %v799_v35 = vsel %vm332_vm9, %v789_v33, %v743_v21 }
 0x32d   :  { %v693_v0 = vpop.permute.xlu0 %692  ;;  %v689_v3 = vpop.permute.xlu1 %688 }
 0x32e   :  { %v702_v9 = vsel %vm259_vm5, %v693_v0, 0  ;;  %v694_v8 = vsel %vm259_vm5, %v687_v57, %v689_v3  ;;  %v699_v10 = vsel %vm259_vm5, %v689_v3, 0 }
 0x32f   :  { %v707_v12 = vmul.bf16 %v702_v9, %v1159_v22  ;;  %v704_v13 = vmul.bf16 %v694_v8, %v1167_v32  ;;  %v705_v14 = vmul.bf16 %v699_v10, %v1159_v22 }
 0x331   :  { %997 = vmatprep.subr.msk.bf16.mxu1 %vm319_vm7, %v707_v12  ;;  %v551_v15 = vpop.permute.xlu0 %550  ;;  %995 = vmatprep.subr.msk.bf16.mxu0 %vm319_vm7, %v705_v14  ;;  %v651_v16 = vpop.permute.xlu1 %650  ;;  %v821_v1 = vsel %vm319_vm7, %v704_v13, 0  ;;  %v602_v12 = vmul.bf16 %v597_v63, %v1167_v32 }
 0x332   :  { %v658_v18 = vsel %vm219_vm2, %v651_v16, %v653_v59  ;;  %837 = vmatpush1.bf16.msra.mxu0 %v821_v1 }
 0x333   :  { %v668_v20 = vmul.bf16 %v658_v18, %v1179_v49  ;;  %v718_v21 = vrot.slane %v602_v12, 4 }
 0x335   :  { %v742_v24 = vrot.slane %v668_v20, 4  ;;  %v573_v25 = vpop.permute.xlu0 %572  ;;  %v675_v26 = vpop.permute.xlu1 %674 }
 0x336   :  { %v680_v28 = vsel %vm243_vm8, %v673_v60, %v675_v26  ;;  %v683_v29 = vsel %vm243_vm8, %v675_v26, 0 }
 0x337   :  { %v748_v30 = vrot.slane %v680_v28, 2  ;;  %v749_v31 = vrot.slane %v683_v29, 2  ;;  %v797_v34 = vsel %vm332_vm9, %v786_v7, %v742_v24  ;;  %v637_v24 = vsel %vm195_vm4, %v1352_v58, %v1348_v53  ;;  %v816_v58 = vld [vmem:[%s1484_s4] sm:$0x3] }
 0x339   :  { %v609_v36 = vpop.permute.xlu0 %608  ;;  %v587_v37 = vpop.permute.xlu1 %586  ;;  %v808_v38 = vsel %vm341_vm10, %v799_v35, %v749_v31  ;;  %v805_v39 = vsel %vm341_vm10, %v797_v34, %v748_v30  ;;  %v648_v31 = vmul.bf16 %v637_v24, %v1167_v32 }
 0x33a   :  { %838 = vmatprep.subr.bf16.mxu0 %v808_v38 }
 0x33b   :  { %839 = vmatpush1.bf16.msra.mxu0 %v805_v39 }
 0x33d   :  { %v657_v41 = vpop.permute.xlu1 %656  ;;  %v679_v44 = vpop.permute.xlu0 %678 }
 0x33e   :  { %v666_v45 = vsel %vm219_vm2, %v657_v41, 0  ;;  %v685_v47 = vsel %vm243_vm8, %v679_v44, 0 }
 0x33f   :  { %v671_v46 = vmul.bf16 %v666_v45, %v1161_v23  ;;  %v751_v60 = vrot.slane %v685_v47, 2 }
 0x341   :  { %v745_v48 = vrot.slane %v671_v46, 4  ;;  %v691_v43 = vpop.permute.xlu1 %690  ;;  %v591_v16 = vpop.permute.xlu0 %590 }
 0x342   :  { %v695_v51 = vsel %vm259_vm5, %v691_v43, %v693_v0  ;;  %v592_v0 = vsel %vm133_vm11, %v1350_v55, %v587_v37  ;;  %v736_v37 = vrot.slane %v648_v31, 6 }
 0x343   :  { %v706_v56 = vmul.bf16 %v695_v51, %v1167_v32  ;;  %v803_v59 = vsel %vm332_vm9, %v795_v54, %v745_v48  ;;  %v603_v13 = vmul.bf16 %v592_v0, %v1159_v22 }
 0x344   :  { %v814_v62 = vsel %vm341_vm10, %v803_v59, %v751_v60  ;;  %v792_v42 = vsel %vm319_vm7, %v1290_v52, %v736_v37 }
 0x345   :  { %v549_v57 = vpop.permute.xlu1 %548  ;;  %v868_v61 = vsel %vm319_vm7, %v706_v56, 0  ;;  %v553_v35 = vpop.permute.xlu0 %552 }
 0x346   :  { %884 = vmatpush1.bf16.msra.mxu1 %v868_v61  ;;  %v556_v50 = vsel %vm78_vm14, %v549_v57, %v551_v15  ;;  %v561_v4 = vsel %vm78_vm14, 0, %v549_v57  ;;  %v564_v57 = vsel %vm78_vm14, 0, %v553_v35 }
 0x347   :  { %885 = vmatprep.subr.bf16.mxu1 %v814_v62  ;;  %v566_v14 = vmul.bf16 %v561_v4, %v1179_v49  ;;  %v567_v6 = vmul.bf16 %v556_v50, %v1161_v23 }
 0x349   :  { %v571_v3 = vpop.permute.xlu1 %570  ;;  %v575_v40 = vpop.permute.xlu0 %574 }
 0x34a   :  { %v578_v9 = vsel %vm117_vm12, %v571_v3, %v573_v25  ;;  %v581_v8 = vsel %vm117_vm12, 0, %v571_v3  ;;  %v719_v25 = vrot.slane %v603_v13, 4  ;;  %v583_v54 = vsel %vm117_vm12, 0, %v575_v40 }
 0x34b   :  { %v710_v10 = vrot.slane %v581_v8, 6  ;;  %v711_v11 = vrot.slane %v578_v9, 6  ;;  %v712_v63 = vrot.slane %v583_v54, 6  ;;  %v568_v9 = vmul.bf16 %v564_v57, %v1179_v49 }
 0x34d   :  { %v607_v55 = vpop.permute.xlu1 %606  ;;  %v754_v17 = vsel %vm319_vm7, %v566_v14, %v710_v10  ;;  %v757_v20 = vsel %vm319_vm7, %v567_v6, %v711_v11  ;;  %v611_v51 = vpop.permute.xlu0 %610  ;;  %v760_v12 = vsel %vm319_vm7, %v568_v9, %v712_v63  ;;  %v1017_v9 = vld [vmem:[%s1480_s0] sm:$0xff] }
 0x34e   :  { %v614_v15 = vsel %vm171_vm13, %v607_v55, %v609_v36  ;;  %v619_v1 = vsel %vm171_vm13, 0, %v607_v55  ;;  %v767_v29 = vsel %vm332_vm9, %v757_v20, %v719_v25  ;;  %v765_v30 = vsel %vm332_vm9, %v754_v17, %v718_v21 }
 0x34f   :  { %v624_v18 = vmul.bf16 %v619_v1, %v1179_v49  ;;  %v625_v19 = vmul.bf16 %v614_v15, %v1161_v23  ;;  %v622_v61 = vsel %vm171_vm13, 0, %v611_v51 }
 0x351   :  { %v726_v26 = vrot.slane %v624_v18, 2  ;;  %v727_v27 = vrot.slane %v625_v19, 2  ;;  %v655_v7 = vpop.permute.xlu1 %654 }
 0x352   :  { %v659_v28 = vsel %vm219_vm2, %v655_v7, %v657_v41 }
 0x353   :  { %v776_v33 = vsel %vm341_vm10, %v767_v29, %v727_v27  ;;  %v773_v34 = vsel %vm341_vm10, %v765_v30, %v726_v26  ;;  %v670_v36 = vmul.bf16 %v659_v28, %v1179_v49 }
 0x354   :  { %840 = vmatprep.subr.bf16.mxu0 %v776_v33 }
 0x355   :  { %841 = vmatpush1.bf16.msra.mxu0 %v773_v34  ;;  %v589_v53 = vpop.permute.xlu1 %588  ;;  %v744_v38 = vrot.slane %v670_v36, 4 }
 0x356   :  { %v600_v43 = vsel %vm133_vm11, 0, %v589_v53  ;;  %v593_v56 = vsel %vm133_vm11, %v589_v53, %v591_v16 }
 0x357   :  { %v801_v46 = vsel %vm332_vm9, %v792_v42, %v744_v38  ;;  %v604_v59 = vmul.bf16 %v600_v43, %v1167_v32  ;;  %v605_v0 = vmul.bf16 %v593_v56, %v1159_v22  ;;  %v626_v32 = vmul.bf16 %v622_v61, %v1179_v49  ;;  %v940_v43 = vld [vmem:[%s1485_s5] sm:$0xf] }
 0x358   :  { %996 = vmatmul.mubr.msk.bf16.vlgmr.msra.gmra.mxu0 %vm387_vm15, %v816_v58  ;;  %v944_v56 = vld [vmem:[%s1486_s6] sm:$0xf] }
 0x359   :  { %v677_v39 = vpop.permute.xlu1 %676  ;;  %v720_v3 = vrot.slane %v604_v59, 4  ;;  %v721_v13 = vrot.slane %v605_v0, 4  ;;  %v728_v6 = vrot.slane %v626_v32, 2 }
 0x35a   :  { %v681_v41 = vsel %vm243_vm8, %v677_v39, %v679_v44 }
 0x35b   :  { %v750_v45 = vrot.slane %v681_v41, 2  ;;  %v769_v22 = vsel %vm332_vm9, %v760_v12, %v720_v3 }
 0x35c   :  { %v779_v49 = vsel %vm341_vm10, %v769_v22, %v728_v6 }
 0x35d   :  { %v555_v47 = vpop.permute.xlu1 %554  ;;  %v811_v48 = vsel %vm341_vm10, %v801_v46, %v750_v45 }
 0x35e   :  { %886 = vmatpush1.bf16.msra.mxu1 %v811_v48  ;;  %v557_v60 = vsel %vm78_vm14, %v553_v35, %v555_v47 }
 0x35f   :  { %v569_v50 = vmul.bf16 %v557_v60, %v1161_v23 }
 0x361   :  { %v577_v44 = vpop.permute.xlu1 %576 }
 0x362   :  { %v579_v52 = vsel %vm117_vm12, %v575_v40, %v577_v44 }
 0x363   :  { %v713_v62 = vrot.slane %v579_v52, 6 }
 0x365   :  { %v613_v4 = vpop.permute.xlu1 %612  ;;  %v763_v11 = vsel %vm319_vm7, %v569_v50, %v713_v62 }
 0x366   :  { %v615_v8 = vsel %vm171_vm13, %v611_v51, %v613_v4  ;;  %v771_v55 = vsel %vm332_vm9, %v763_v11, %v721_v13 }
 0x367   :  { %v627_v10 = vmul.bf16 %v615_v8, %v1161_v23 }
 0x369   :  { %v729_v14 = vrot.slane %v627_v10, 2  ;;  %v1018_v10 = vld [vmem:[%s1480_s0 + $0x8] sm:$0xff] }
 0x36b   :  { %v782_v16 = vsel %vm341_vm10, %v771_v55, %v729_v14 }
 0x36c   :  { %887 = vmatprep.subr.bf16.mxu1 %v782_v16 }
 0x36d   :  { %888 = vmatpush1.bf16.msra.mxu1 %v779_v49 }
 0x370   :  { %998 = vmatmul.mubr.msk.bf16.vlgmr.msra.gmra.mxu1 %vm387_vm15, %v816_v58 }
 0x418   :  { %v860_v23 = vpop.f32.mrf.mxu0 }
 0x419   :  { %v923_v18 = vmul.f32 %v860_v23, %v860_v23  ;;  %v914_v20 = vsel %vm332_vm9, %v860_v23, 0.0 }
 0x41a   :  { %v862_v15 = vpop.f32.mrf.mxu0 }
 0x41b   :  { %v924_v19 = vmul.f32 %v862_v15, %v862_v15  ;;  %v915_v21 = vsel %vm332_vm9, %v862_v15, 0.0  ;;  %v927_v24 = vsel %vm332_vm9, %v923_v18, 0.0 }
 0x41c   :  { %v864_v1 = vpop.f32.mrf.mxu0  ;;  %v916_v26 = vadd.f32 %v915_v21, %v914_v20 }
 0x41d   :  { %v928_v25 = vsel %vm332_vm9, %v924_v19, 0.0 }
 0x41e   :  { %v865_v17 = vpop.f32.mrf.mxu0  ;;  %v929_v31 = vadd.f32 %v928_v25, %v927_v24 }
 0x430   :  { %v907_v27 = vpop.f32.mrf.mxu1 }
 0x431   :  { %v917_v7 = vsel %vm332_vm9, %v907_v27, 0.0  ;;  %v925_v28 = vmul.f32 %v907_v27, %v907_v27 }
 0x432   :  { %v909_v29 = vpop.f32.mrf.mxu1  ;;  %v918_v30 = vadd.f32 %v917_v7, %v916_v26 }
 0x433   :  { %v926_v33 = vmul.f32 %v909_v29, %v909_v29  ;;  %v919_v34 = vsel %vm332_vm9, %v909_v29, 0.0  ;;  %v930_v35 = vsel %vm332_vm9, %v925_v28, 0.0 }
 0x434   :  { %v911_v36 = vpop.f32.mrf.mxu1  ;;  %v920_v53 = vadd.f32 %v919_v34, %v918_v30  ;;  %v931_v58 = vadd.f32 %v930_v35, %v929_v31 }
 0x435   :  { %v932_v37 = vsel %vm332_vm9, %v926_v33, 0.0 }
 0x436   :  { %921 = vadd.xlane.f32.xlu0 %v920_v53  ;;  %v912_v38 = vpop.f32.mrf.mxu1  ;;  %v933_v39 = vadd.f32 %v932_v37, %v931_v58 }
 0x438   :  { %934 = vadd.xlane.f32.xlu1 %v933_v39 }
 0x4bf   :  { %v922_v40 = vpop.xlane.xlu0 %921 }
 0x4c0   :  { %v936_v41 = vmul.f32 0.001953125, %v922_v40 }
 0x4c1   :  { %v935_v42 = vpop.xlane.xlu1 %934 }
 0x4c2   :  { %v938_v45 = vmul.f32 %v936_v41, %v936_v41  ;;  %v937_v46 = vmul.f32 0.001953125, %v935_v42 }
 0x4c4   :  { %v939_v47 = vsub.f32 %v937_v46, %v938_v45 }
 0x4c6   :  { %v941_v48 = vadd.f32 1e-05, %v939_v47 }
 0x4c8   :  { %1015 = vrsqrt.f32 %v941_v48 }
 0x4d5   :  { %v1016_v51 = vpop.eup %1015 }
 0x4d6   :  { %v943_v54 = vmul.f32 %v1016_v51, %v940_v43 }
 0x4d8   :  { %949 = vperm.xlu0 %1009, %v943_v54   ;;  %v945_v59 = vmul.f32 %v943_v54, %v936_v41 }
 0x4da   :  { %v946_v44 = vsub.f32 %v944_v56, %v945_v59 }
 0x4dc   :  { %958 = vperm.xlu1 %1010, %v946_v44  }
 0x553   :  { %v950_v60 = vpop.permute.xlu0 %949 }
 0x554   :  { %v952_v52 = vmul.f32 %v950_v60, %v860_v23  ;;  %v953_v57 = vmul.f32 %v950_v60, %v862_v15  ;;  %v954_v61 = vmul.f32 %v950_v60, %v907_v27  ;;  %v955_v62 = vmul.f32 %v950_v60, %v909_v29 }
 0x557   :  { %v959_v63 = vpop.permute.xlu1 %958 }
 0x558   :  { %v961_v0 = vadd.f32 %v959_v63, %v952_v52  ;;  %v962_v3 = vadd.f32 %v959_v63, %v953_v57  ;;  %v963_v50 = vadd.f32 %v959_v63, %v954_v61  ;;  %v964_v4 = vadd.f32 %v959_v63, %v955_v62 }
 0x55a   :  { %v965_v32 = vadd.f32 %v1017_v9, %v961_v0  ;;  %v966_v8 = vadd.f32 %v962_v3, %v1074_v2  ;;  %v967_v11 = vadd.f32 %v1018_v10, %v963_v50  ;;  %v968_v12 = vadd.f32 %v964_v4, %v1091_v5 }
 0x55c   :  { %v969_v13 = vmax.f32 %v965_v32, 0.0  ;;  %v970_v14 = vmax.f32 %v966_v8, 0.0  ;;  %v971_v22 = vmax.f32 %v967_v11, 0.0  ;;  %v972_v6 = vmax.f32 %v968_v12, 0.0 }
 0x55e   :  { %v977_v55 = vcombine.low %v969_v13, %v970_v14  ;;  %v978_v16 = vcombine.low %v971_v22, %v972_v6 }
 0x560   :  { %981 = vst [vmem:[%s1487_s7] sm:$0xff] %v977_v55  ;;  %982 = vst [vmem:[%s1487_s7 + $0x8] sm:$0xff] %v978_v16 }

</bundles_post_ra>
